<compile_context>
chip_gen: v5e
topology: v5e:2x2
jax: 0.10.0
libtpu: 0.0.40
codegen_flags: <defaults>
</compile_context>

<pallas_src>
import functools

import jax
import jax.numpy as jnp
from jax import lax
from jax.experimental import pallas as pl
from jax.experimental.pallas import tpu as pltpu


# ----------------------------------------------------------------------------
# helpers
# ----------------------------------------------------------------------------
def _round_up(x, m):
    return ((x + m - 1) // m) * m


def _apply_act(v, act):
    if act == "none":
        return v
    if act == "lrelu":
        return jnp.where(v > 0, v, 0.2 * v)
    if act == "relu":
        return jnp.maximum(v, 0.0)
    if act == "sigmoid":
        return 1.0 / (1.0 + jnp.exp(-v))
    raise ValueError(act)


def _fold_factor(c):
    return max(1, 128 // c)


def _fold(x):
    """(N, H, W, C) -> (N, HW//F, F*C) lane-dense view for norm/SE kernels."""
    n, h, w, c = x.shape
    f = _fold_factor(c)
    hw = h * w
    assert hw % f == 0, (hw, f)
    return x.reshape(n, hw // f, f * c), f


def _fold_matrix(c, f):
    """(F*C, F*C) matrix that sums lane groups belonging to the same channel."""
    fc = f * c
    idx = jnp.arange(fc, dtype=jnp.int32) % c
    return (idx[:, None] == idx[None, :]).astype(jnp.float32)


# ----------------------------------------------------------------------------
# fused matmul + bias + activation (conv / conv-transpose hot path)
# ----------------------------------------------------------------------------
def _mm_kernel(x_ref, w_ref, b_ref, o_ref, *, act):
    acc = jnp.dot(x_ref[...], w_ref[...], preferred_element_type=jnp.float32)
    acc = acc + b_ref[...]
    o_ref[...] = _apply_act(acc, act).astype(o_ref.dtype)


def matmul_fused(x, w, b, act="none"):
    """x:(M,K) bf16, w:(K,N) bf16, b:(N,) f32 -> (M,N) f32 with fused bias + act."""
    m, k = x.shape
    kw_, n = w.shape
    assert k == kw_
    tm = min(512, _round_up(m, 8))
    mp = _round_up(m, tm)
    if n >= 128 and n % 128 == 0:
        np_ = n
        tn = 256 if n % 256 == 0 else 128
    elif n < 128:
        np_, tn = n, n                      # full-extent lane block (no padding)
    else:
        np_ = _round_up(n, 128)
        tn = 128
    xp = x if mp == m else jnp.pad(x, ((0, mp - m), (0, 0)))
    wp = w if np_ == n else jnp.pad(w, ((0, 0), (0, np_ - n)))
    bp = (b if np_ == n else jnp.pad(b, (0, np_ - n))).astype(jnp.float32)
    bp = bp.reshape(1, np_)

    out = pl.pallas_call(
        functools.partial(_mm_kernel, act=act),
        out_shape=jax.ShapeDtypeStruct((mp, np_), jnp.float32),
        grid=(mp // tm, np_ // tn),
        in_specs=[
            pl.BlockSpec((tm, k), lambda i, j: (i, 0)),
            pl.BlockSpec((k, tn), lambda i, j: (0, j)),
            pl.BlockSpec((1, tn), lambda i, j: (0, j)),
        ],
        out_specs=pl.BlockSpec((tm, tn), lambda i, j: (i, j)),
        compiler_params=pltpu.CompilerParams(
            dimension_semantics=("parallel", "parallel")),
    )(xp, wp, bp)
    if mp != m or np_ != n:
        out = out[:m, :n]
    return out


# ----------------------------------------------------------------------------
# fused instance-norm kernels (lane-folded layout)
# ----------------------------------------------------------------------------
def _in_stats(x, fold, inv_hw, eps):
    cs = jnp.sum(x, axis=0, keepdims=True)                       # (1, FC)
    mean = jnp.dot(jnp.broadcast_to(cs, (8, cs.shape[1])), fold,
                   preferred_element_type=jnp.float32)[0:1] * inv_hw
    d = x - mean
    ds = jnp.sum(d * d, axis=0, keepdims=True)
    var = jnp.dot(jnp.broadcast_to(ds, (8, ds.shape[1])), fold,
                  preferred_element_type=jnp.float32)[0:1] * inv_hw
    return d * lax.rsqrt(var + eps)


def _in_kernel(x_ref, fold_ref, o_ref, *, inv_hw, eps, act):
    y = _in_stats(x_ref[...], fold_ref[...], inv_hw, eps)
    o_ref[...] = _apply_act(y, act)


def _in_res_kernel(x_ref, x0_ref, fold_ref, o_ref, *, inv_hw, eps, alpha):
    y = _in_stats(x_ref[...], fold_ref[...], inv_hw, eps)
    o_ref[...] = alpha * x0_ref[...] + y


@functools.partial(jax.jit, static_argnames=("act", "eps"))
def instance_norm(x, *, act="none", eps=1e-5):
    n, h, w, c = x.shape
    x3, f = _fold(x)
    _, r, fc = x3.shape
    fold = _fold_matrix(c, f)
    y = pl.pallas_call(
        functools.partial(_in_kernel, inv_hw=1.0 / (h * w), eps=eps, act=act),
        out_shape=jax.ShapeDtypeStruct((n, r, fc), jnp.float32),
        grid=(n,),
        in_specs=[pl.BlockSpec((None, r, fc), lambda i: (i, 0, 0)),
                  pl.BlockSpec((fc, fc), lambda i: (0, 0))],
        out_specs=pl.BlockSpec((None, r, fc), lambda i: (i, 0, 0)),
        compiler_params=pltpu.CompilerParams(dimension_semantics=("parallel",)),
    )(x3, fold)
    return y.reshape(n, h, w, c)


@functools.partial(jax.jit, static_argnames=("alpha", "eps"))
def instance_norm_residual(h_in, x0, *, alpha, eps=1e-5):
    """InstanceNorm(h_in) fused with the ResidualBlock tail alpha*x0 + norm."""
    n, h, w, c = h_in.shape
    h3, f = _fold(h_in)
    x3, _ = _fold(x0)
    _, r, fc = h3.shape
    fold = _fold_matrix(c, f)
    y = pl.pallas_call(
        functools.partial(_in_res_kernel, inv_hw=1.0 / (h * w), eps=eps,
                          alpha=float(alpha)),
        out_shape=jax.ShapeDtypeStruct((n, r, fc), jnp.float32),
        grid=(n,),
        in_specs=[pl.BlockSpec((None, r, fc), lambda i: (i, 0, 0)),
                  pl.BlockSpec((None, r, fc), lambda i: (i, 0, 0)),
                  pl.BlockSpec((fc, fc), lambda i: (0, 0))],
        out_specs=pl.BlockSpec((None, r, fc), lambda i: (i, 0, 0)),
        compiler_params=pltpu.CompilerParams(dimension_semantics=("parallel",)),
    )(h3, x3, fold)
    return y.reshape(n, h, w, c)


# ----------------------------------------------------------------------------
# fused SE block kernel: avg-pool + FC + relu + FC + sigmoid + scale (+ post act)
# ----------------------------------------------------------------------------
def _se_kernel(x_ref, w1_ref, w2_ref, o_ref, *, inv_hw, act):
    x = x_ref[...]                                       # (R, FC) f32
    y = jnp.sum(x, axis=0, keepdims=True) * inv_hw       # folded partial means
    yb = jnp.broadcast_to(y, (8, y.shape[1]))
    hid = jnp.maximum(
        jnp.dot(yb, w1_ref[...], preferred_element_type=jnp.float32), 0.0)
    s = jnp.dot(hid, w2_ref[...], preferred_element_type=jnp.float32)
    s = 1.0 / (1.0 + jnp.exp(-s))
    o_ref[...] = _apply_act(x * s[0:1, :], act)


@functools.partial(jax.jit, static_argnames=("post_act",))
def se_block(x, w1f, w2f, *, post_act="none"):
    n, h, w, c = x.shape
    x3, _ = _fold(x)
    _, r, fc = x3.shape
    y = pl.pallas_call(
        functools.partial(_se_kernel, inv_hw=1.0 / (h * w), act=post_act),
        out_shape=jax.ShapeDtypeStruct((n, r, fc), jnp.float32),
        grid=(n,),
        in_specs=[pl.BlockSpec((None, r, fc), lambda i: (i, 0, 0)),
                  pl.BlockSpec((fc, 128), lambda i: (0, 0)),
                  pl.BlockSpec((128, fc), lambda i: (0, 0))],
        out_specs=pl.BlockSpec((None, r, fc), lambda i: (i, 0, 0)),
        compiler_params=pltpu.CompilerParams(dimension_semantics=("parallel",)),
    )(x3, w1f, w2f)
    return y.reshape(n, h, w, c)


# ----------------------------------------------------------------------------
# conv / conv-transpose wrappers (NHWC, im2col -> fused GEMM)
# ----------------------------------------------------------------------------
@functools.partial(jax.jit, static_argnames=("cout", "k", "stride", "pad", "act"))
def conv2d(x, w_mat, b, *, cout, k, stride, pad, act="none"):
    """x: (N,H,W,C) f32, w_mat: (k*k*C, cout) bf16 (pre-transformed torch weight)."""
    n, h, w, c = x.shape
    ho = (h + 2 * pad - k) // stride + 1
    wo = (w + 2 * pad - k) // stride + 1
    xb = x.astype(jnp.bfloat16)
    xp = jnp.pad(xb, ((0, 0), (pad, pad), (pad, pad), (0, 0)))
    cols = [xp[:, i:i + stride * (ho - 1) + 1:stride,
               j:j + stride * (wo - 1) + 1:stride, :]
            for i in range(k) for j in range(k)]
    patches = jnp.concatenate(cols, axis=-1).reshape(n * ho * wo, k * k * c)
    y = matmul_fused(patches, w_mat, b, act=act)
    return y.reshape(n, ho, wo, cout)


@functools.partial(jax.jit, static_argnames=("cout", "pre_act", "act"))
def conv_transpose2d(x, w_mat, b_all, *, cout, pre_act="none", act="none"):
    """ConvTranspose2d(k=4, s=2, p=1) via sub-pixel decomposition (single GEMM).

    w_mat: (4*Cin, 4*Cout) bf16 combined weight, b_all: (4*Cout,) f32 tiled bias.
    """
    n, h, w, c = x.shape
    if pre_act != "none":
        x = _apply_act(x, pre_act)
    xb = x.astype(jnp.bfloat16)
    xp = jnp.pad(xb, ((0, 0), (1, 1), (1, 1), (0, 0)))
    hp, wp = h + 1, w + 1
    cols = [xp[:, dy:dy + hp, dx:dx + wp, :] for dy in (0, 1) for dx in (0, 1)]
    patches = jnp.concatenate(cols, axis=-1).reshape(n * hp * wp, 4 * c)
    y = matmul_fused(patches, w_mat, b_all, act=act)
    y = y.reshape(n, hp, wp, 2, 2, cout)
    out = jnp.zeros((n, 2 * h, 2 * w, cout), jnp.float32)
    for a in (0, 1):
        for bb in (0, 1):
            out = out.at[:, a::2, bb::2, :].set(y[:, a:a + h, bb:bb + w, a, bb, :])
    return out


# ----------------------------------------------------------------------------
# module forward passes
# ----------------------------------------------------------------------------
def residual_block(x, p, alpha):
    c = x.shape[-1]
    t = conv2d(x, p["w1m"], p["b1"], cout=c, k=3, stride=1, pad=1, act="none")
    t = instance_norm(t, act="lrelu")                       # IN + LeakyReLU fused
    t = conv2d(t, p["w2m"], p["b2"], cout=c, k=3, stride=1, pad=1, act="none")
    return instance_norm_residual(t, x, alpha=alpha)        # IN + alpha*x fused


def unet_block_forward(x, p):
    kind = p["kind"]
    if kind == "outermost":
        # child block's in-place LeakyReLU(0.2) fused into the downconv epilogue
        h = conv2d(x, p["down_wm"], p["down_b"], cout=p["inner_nc"], k=4,
                   stride=2, pad=1, act="lrelu")
        h = unet_block_forward(h, p["sub"])
        return conv_transpose2d(h, p["up_wm"], p["up_b"], cout=p["outer_nc"],
                                pre_act="relu", act="sigmoid")

    if kind == "innermost":
        # x already carries leaky_relu() applied by the parent (in-place semantics)
        h = conv2d(x, p["down_wm"], p["down_b"], cout=p["inner_nc"], k=4,
                   stride=2, pad=1, act="relu")             # uprelu fused
        h = conv_transpose2d(h, p["up_wm"], p["up_b"], cout=p["outer_nc"],
                             pre_act="none", act="none")
        h = instance_norm(h)
        return jnp.concatenate([x, h], axis=-1)

    # middle block (x already leaky_relu'd by the parent, used for the skip too)
    h = conv2d(x, p["down_wm"], p["down_b"], cout=p["inner_nc"], k=4,
               stride=2, pad=1, act="none")
    h = instance_norm(h)
    for rp in p["res_in"]:
        h = residual_block(h, rp, p["alpha"])
    h = se_block(h, p["se_in"]["w1f"], p["se_in"]["w2f"],
                 post_act="lrelu")                          # submodule's downrelu fused
    h = unet_block_forward(h, p["sub"])
    h = conv_transpose2d(h, p["up_wm"], p["up_b"], cout=p["outer_nc"],
                         pre_act="relu", act="none")
    h = instance_norm(h)
    for rp in p["res_out"]:
        h = residual_block(h, rp, p["alpha"])
    h = se_block(h, p["se_out"]["w1f"], p["se_out"]["w2f"], post_act="none")
    return jnp.concatenate([x, h], axis=-1)


def unet_generator_forward(x_nchw, params):
    x = jnp.transpose(x_nchw, (0, 2, 3, 1))                 # NCHW -> NHWC once
    y = unet_block_forward(x, params)
    return jnp.transpose(y, (0, 3, 1, 2))                   # back to NCHW


# ----------------------------------------------------------------------------
# parameter construction (torch layouts -> TPU GEMM layouts, done once at init)
# ----------------------------------------------------------------------------
def _conv_mat(w):
    """torch Conv2d weight (Cout, Cin, kh, kw) -> GEMM weight (kh*kw*Cin, Cout) bf16."""
    cout = w.shape[0]
    return jnp.transpose(w, (2, 3, 1, 0)).reshape(-1, cout).astype(jnp.bfloat16)


def _convT_mat(w):
    """torch ConvTranspose2d weight (Cin, Cout, 4, 4) -> sub-pixel GEMM weight
    (4*Cin, 4*Cout) bf16. K index order = (dy, dx, ci); N index order = (a, b, co)."""
    cin, cout = w.shape[0], w.shape[1]
    sel = ((3, 1), (2, 0))          # kernel tap per (output parity, patch offset)
    wk = jnp.zeros((4 * cin, 4 * cout), jnp.float32)
    for dy in (0, 1):
        for dx in (0, 1):
            for a in (0, 1):
                for bb in (0, 1):
                    blk = w[:, :, sel[a][dy], sel[bb][dx]]
                    wk = wk.at[(dy * 2 + dx) * cin:(dy * 2 + dx + 1) * cin,
                               (a * 2 + bb) * cout:(a * 2 + bb + 1) * cout].set(blk)
    return wk.astype(jnp.bfloat16)


def _se_fold(w1, w2, c):
    """torch Linear weights w1:(C/r, C), w2:(C, C/r) -> lane-folded, 128-padded mats."""
    f = _fold_factor(c)
    cr = w1.shape[0]
    w1f = jnp.zeros((f * c, 128), jnp.float32).at[:, :cr].set(jnp.tile(w1.T, (f, 1)))
    w2f = jnp.zeros((128, f * c), jnp.float32).at[:cr, :].set(jnp.tile(w2.T, (1, f)))
    return w1f, w2f


def init_unet_params(key, input_nc, output_nc, num_downs, ngf):
    keys = iter(jax.random.split(key, 1024))

    def nrm(shape):
        return 0.02 * jax.random.normal(next(keys), shape, jnp.float32)

    def res_params(nf):
        return {"w1m": _conv_mat(nrm((nf, nf, 3, 3))),
                "b1": jnp.zeros((nf,), jnp.float32),
                "w2m": _conv_mat(nrm((nf, nf, 3, 3))),
                "b2": jnp.zeros((nf,), jnp.float32)}

    def se_params(c, reduction=16):
        cr = max(1, c // reduction)
        w1f, w2f = _se_fold(nrm((cr, c)), nrm((c, cr)), c)
        return {"w1f": w1f, "w2f": w2f}

    def block(outer_nc, inner_nc, input_nc_, kind, depth):
        in_c = outer_nc if input_nc_ is None else input_nc_
        p = {"kind": kind, "inner_nc": inner_nc, "outer_nc": outer_nc,
             "down_wm": _conv_mat(nrm((inner_nc, in_c, 4, 4))),
             "down_b": jnp.zeros((inner_nc,), jnp.float32)}
        up_in = inner_nc if kind == "innermost" else inner_nc * 2
        p["up_wm"] = _convT_mat(nrm((up_in, outer_nc, 4, 4)))
        p["up_b"] = jnp.zeros((4 * outer_nc,), jnp.float32)   # (a,b,co) tiled bias
        if kind == "middle":
            p["res_in"] = [res_params(inner_nc) for _ in range(3)]
            p["res_out"] = [res_params(outer_nc) for _ in range(3)]
            p["se_in"] = se_params(inner_nc)
            p["se_out"] = se_params(outer_nc)
            # ResidualBlock alpha_l with depth+1, total_depth=num_downs, alpha_min=0.5
            p["alpha"] = 1.0 - ((1.0 - 0.5) / num_downs) * (depth + 1)
        return p

    blk = block(ngf * 16, ngf * 16, None, "innermost", 0)
    for i in range(num_downs - 7):
        mid = block(ngf * 16, ngf * 16, None, "middle", i + 1)
        mid["sub"] = blk
        blk = mid
    for outer, inner, depth in [(ngf * 8, ngf * 16, num_downs - 6),
                                (ngf * 8, ngf * 8, num_downs - 5),
                                (ngf * 4, ngf * 8, num_downs - 4),
                                (ngf * 2, ngf * 4, num_downs - 3),
                                (ngf, ngf * 2, num_downs - 2)]:
        mid = block(outer, inner, None, "middle", depth)
        mid["sub"] = blk
        blk = mid
    top = block(output_nc, ngf, input_nc, "outermost", num_downs - 1)
    top["sub"] = blk
    return top


# ----------------------------------------------------------------------------
# main
# ----------------------------------------------------------------------------
if __name__ == "__main__":
    # ngf=16 is the smallest keeping SEBlock's channel//16 linear valid; the
    # architecture always performs 7 downsamplings -> 128x128 input required.
    input_nc, output_nc, num_downs, ngf = 3, 3, 7, 16
    key = jax.random.PRNGKey(0)
    kparam, kx = jax.random.split(key)

    params = init_unet_params(kparam, input_nc, output_nc, num_downs, ngf)
    x = jax.random.normal(kx, (1, input_nc, 128, 128), jnp.float32)

    out = unet_generator_forward(x, params)
    out = jax.block_until_ready(out)

    assert out.shape == (1, output_nc, 128, 128), out.shape
    assert bool(jnp.all(jnp.isfinite(out)))
    print("KERNEL_OK")
</pallas_src>

<mosaic_0001>
module attributes {stable_mosaic.version = 11 : i64} {
  func.func @_mm_kernel(%arg0: i32, %arg1: i32, %arg2: memref<512x48xbf16, #tpu.memory_space<vmem>>, %arg3: memref<48x16xbf16, #tpu.memory_space<vmem>>, %arg4: memref<1x16xf32, #tpu.memory_space<vmem>>, %arg5: memref<512x16xf32, #tpu.memory_space<vmem>>) attributes {dimension_semantics = [#tpu.dimension_semantics<parallel>, #tpu.dimension_semantics<parallel>], iteration_bounds = array<i64: 8, 1>, scalar_prefetch = 0 : i64, scratch_operands = 0 : i64, tpu.core_type = #tpu.core_type<tc>, window_params = [{transform_indices = @transform_0, window_bounds = array<i64: 512, 48>}, {transform_indices = @transform_1, window_bounds = array<i64: 48, 16>}, {transform_indices = @transform_2, window_bounds = array<i64: 1, 16>}, {transform_indices = @transform_3, window_bounds = array<i64: 512, 16>}]} {
    %c0 = arith.constant 0 : index
    %c0_0 = arith.constant 0 : index
    %0 = vector.load %arg2[%c0, %c0_0] : memref<512x48xbf16, #tpu.memory_space<vmem>>, vector<512x48xbf16>
    %c0_1 = arith.constant 0 : index
    %c0_2 = arith.constant 0 : index
    %1 = vector.load %arg3[%c0_1, %c0_2] : memref<48x16xbf16, #tpu.memory_space<vmem>>, vector<48x16xbf16>
    %cst = arith.constant dense<0.000000e+00> : vector<512x16xf32>
    %2 = tpu.matmul %0, %1, %cst {dimension_numbers = #tpu.dot_dimension_numbers<[1], [0], [0], [1], [0, 0, 1, 1], [], []>} : vector<512x48xbf16>, vector<48x16xbf16>, vector<512x16xf32> -> vector<512x16xf32>
    %c0_3 = arith.constant 0 : index
    %c0_4 = arith.constant 0 : index
    %3 = vector.load %arg4[%c0_3, %c0_4] : memref<1x16xf32, #tpu.memory_space<vmem>>, vector<1x16xf32>
    %4 = vector.broadcast %3 : vector<1x16xf32> to vector<512x16xf32>
    %5 = arith.addf %2, %4 : vector<512x16xf32>
    %cst_5 = arith.constant 0.000000e+00 : f32
    %6 = vector.broadcast %cst_5 : f32 to vector<512x16xf32>
    %7 = arith.cmpf ogt, %5, %6 : vector<512x16xf32>
    %cst_6 = arith.constant 2.000000e-01 : f32
    %8 = vector.broadcast %cst_6 : f32 to vector<512x16xf32>
    %9 = arith.mulf %8, %5 : vector<512x16xf32>
    %10 = arith.select %7, %5, %9 : vector<512x16xi1>, vector<512x16xf32>
    %c0_7 = arith.constant 0 : index
    %c0_8 = arith.constant 0 : index
    %11 = vector.load %arg5[%c0_7, %c0_8] : memref<512x16xf32, #tpu.memory_space<vmem>>, vector<512x16xf32>
    tpu.vector_store %arg5[%c0_7, %c0_8], %10 {strides = array<i32>} : memref<512x16xf32, #tpu.memory_space<vmem>>, vector<512x16xf32>,
    return
  }
  func.func @transform_0(%arg0: i32, %arg1: i32) -> (i32, i32) {
    %c0_i32 = arith.constant 0 : i32
    %c0_i32_0 = arith.constant 0 : i32
    return %arg0, %c0_i32 : i32, i32
  }
  func.func @transform_1(%arg0: i32, %arg1: i32) -> (i32, i32) {
    %c0_i32 = arith.constant 0 : i32
    %c0_i32_0 = arith.constant 0 : i32
    return %c0_i32, %arg1 : i32, i32
  }
  func.func @transform_2(%arg0: i32, %arg1: i32) -> (i32, i32) {
    %c0_i32 = arith.constant 0 : i32
    %c0_i32_0 = arith.constant 0 : i32
    return %c0_i32, %arg1 : i32, i32
  }
  func.func @transform_3(%arg0: i32, %arg1: i32) -> (i32, i32) {
    %c0_i32 = arith.constant 0 : i32
    return %arg0, %arg1 : i32, i32
  }
}

</mosaic_0001>

<bundles_post_ra>
// kernel: conv2d.1
= control target key start
LH: loop header
LB: loop body
LE: loop exit
PB: predicated region body
PF: predicated region fallthrough
CT: control target
= control target key end

     0   :  { %s1401_s12 = smov 0   ;;  %s1403_s13 = smov 0   ;;  %s1712_s0 = inlined_call_operand.vmem [shape: bf16[4096,48], index: 0, kind: input, shape index: {}]   ;;  %s1713_s1 = inlined_call_operand.vmem [shape: bf16[48,16], index: 1, kind: input, shape index: {}]   ;;  %s1714_s2 = inlined_call_operand.vmem [shape: f32[1,16], index: 2, kind: input, shape index: {}]   ;;  %s1715_s3 = inlined_call_operand.vmem [shape: f32[4096,16], index: 3, kind: output, shape index: {}]  }
   0x1   :  { %s1405_s14 = smov 0  }
   0x2 LB: > { %s25_s15 = sadd.s32 1, %s1375_s13  ;;  %p1109_p0 = scmp.ge.s32.totalorder %s1379_s14, 1  ;;  %s1379_s14 = sphi %s1405_s14, %s13_s14   ;;  %s1375_s13 = sphi %s1403_s13, %s1717_s13   ;;  %s1371_s12 = sphi %s1401_s12, %s1716_s12  }
   0x3   : > { %p27_p1 = scmp.ge.s32.totalorder %s25_s15, 8  ;;  %p169_p2 = scmp.lt.s32.totalorder %s1379_s14, 9 }
   0x5   : > { %s1719_s15 = smov (%p27_p1, %s25_s15), 0  ;;  %p170_p3 = pnand %p1109_p0, %p169_p2 }
   0x6   : > { %s1110_s18 = sshll.u32 (!%p170_p3), %s1371_s12, 6 }
   0x7   : > { %173 = sbr.rel (%p170_p3) target bundleno = 284 (0x11c), region = 32  ;;  %p204_p4 = scmp.lt.s32.totalorder (!%p170_p3), %s1110_s18, 511 }
   0xc   : > { %v1322_v0 = vld [vmem:[%s1713_s1 + $0x10] sm:$0xff]  ;;  %v1321_v1 = vld [vmem:[%s1713_s1 + $0x8] sm:$0xff]  ;;  %s1721_s18 = smov (!%p204_p4, %s1110_s18), 511  ;;  %v1320_v2 = vld [vmem:[%s1713_s1] sm:$0xff]  ;;  %vm478_vm0 = vcmask 392192   ;;  %vm936_vm1 = vcmask 130048  }
   0xd   : > { %580 = vmatpush.bf16.msra.mxu0 %v1322_v0  ;;  %1323 = vmatpush.bf16.msra.mxu1 %v1322_v0  ;;  %s1111_s21 = sshll.u32 %s1721_s18, 2  ;;  %v1503_v35 = vld [vmem:[%s1714_s2] ss:$0 sm:$0xff]  ;;  %s1113_s29 = sshll.u32 %s1721_s18, 3 }
   0xe   : > { %1324 = vmatpush.bf16.msra.mxu2 %v1322_v0  ;;  %1325 = vmatpush.bf16.msra.mxu3 %v1322_v0  ;;  %s1434_s26 = scalar_lea.vmem %s1712_s0, %s1111_s21  ;;  %s1511_s5 = scalar_lea.vmem %s1715_s3, %s1113_s29 }
   0xf   : > { %v1288_v3 = vld [vmem:[%s1434_s26] sm:$0xff]  ;;  %v1289_v7 = vld [vmem:[%s1434_s26 + $0x8] sm:$0xff]  ;;  %v1290_v11 = vld [vmem:[%s1434_s26 + $0x10] sm:$0xff] }
  0x10   : > { %v1296_v4 = vld [vmem:[%s1434_s26 + $0x40] sm:$0xff]  ;;  %v1297_v8 = vld [vmem:[%s1434_s26 + $0x48] sm:$0xff]  ;;  %v1298_v12 = vld [vmem:[%s1434_s26 + $0x50] sm:$0xff] }
  0x11   : > { %581 = vmatpush.bf16.msra.mxu0 %v1321_v1  ;;  %1326 = vmatpush.bf16.msra.mxu1 %v1321_v1  ;;  %v1304_v5 = vld [vmem:[%s1434_s26 + $0x80] sm:$0xff]  ;;  %v1305_v9 = vld [vmem:[%s1434_s26 + $0x88] sm:$0xff]  ;;  %v1306_v13 = vld [vmem:[%s1434_s26 + $0x90] sm:$0xff] }
  0x12   : > { %1327 = vmatpush.bf16.msra.mxu2 %v1321_v1  ;;  %1328 = vmatpush.bf16.msra.mxu3 %v1321_v1  ;;  %v1312_v6 = vld [vmem:[%s1434_s26 + $0xc0] sm:$0xff]  ;;  %v1313_v10 = vld [vmem:[%s1434_s26 + $0xc8] sm:$0xff]  ;;  %v1314_v14 = vld [vmem:[%s1434_s26 + $0xd0] sm:$0xff] }
  0x13   : > { %v1291_v15 = vld [vmem:[%s1434_s26 + $0x18] sm:$0xff]  ;;  %v1292_v19 = vld [vmem:[%s1434_s26 + $0x20] sm:$0xff]  ;;  %v1293_v23 = vld [vmem:[%s1434_s26 + $0x28] sm:$0xff] }
  0x14   : > { %v1299_v16 = vld [vmem:[%s1434_s26 + $0x58] sm:$0xff]  ;;  %v1300_v20 = vld [vmem:[%s1434_s26 + $0x60] sm:$0xff]  ;;  %v1301_v24 = vld [vmem:[%s1434_s26 + $0x68] sm:$0xff] }
  0x15   : > { %582 = vmatpush.bf16.msra.mxu0 %v1320_v2  ;;  %1329 = vmatpush.bf16.msra.mxu1 %v1320_v2  ;;  %v1307_v17 = vld [vmem:[%s1434_s26 + $0x98] sm:$0xff]  ;;  %v1308_v21 = vld [vmem:[%s1434_s26 + $0xa0] sm:$0xff]  ;;  %v1309_v25 = vld [vmem:[%s1434_s26 + $0xa8] sm:$0xff] }
  0x16   : > { %1330 = vmatpush.bf16.msra.mxu2 %v1320_v2  ;;  %1331 = vmatpush.bf16.msra.mxu3 %v1320_v2  ;;  %v1315_v18 = vld [vmem:[%s1434_s26 + $0xd8] sm:$0xff]  ;;  %v1316_v22 = vld [vmem:[%s1434_s26 + $0xe0] sm:$0xff]  ;;  %v1317_v26 = vld [vmem:[%s1434_s26 + $0xe8] sm:$0xff] }
  0x17   : > { %v1294_v27 = vld [vmem:[%s1434_s26 + $0x30] sm:$0xff]  ;;  %v1295_v31 = vld [vmem:[%s1434_s26 + $0x38] sm:$0xff] }
  0x18   : > { %1254 = vmatmul.msk.bf16.vlgmr.msra.gmra.mxu0 %vm478_vm0, %v1288_v3  ;;  %1262 = vmatmul.msk.bf16.vlgmr.msra.gmra.mxu1 %vm478_vm0, %v1296_v4  ;;  %v1302_v28 = vld [vmem:[%s1434_s26 + $0x70] sm:$0xff]  ;;  %v1303_v32 = vld [vmem:[%s1434_s26 + $0x78] sm:$0xff] }
  0x19   : > { %1270 = vmatmul.msk.bf16.vlgmr.msra.gmra.mxu2 %vm478_vm0, %v1304_v5  ;;  %1278 = vmatmul.msk.bf16.vlgmr.msra.gmra.mxu3 %vm478_vm0, %v1312_v6  ;;  %v1310_v29 = vld [vmem:[%s1434_s26 + $0xb0] sm:$0xff]  ;;  %v1311_v33 = vld [vmem:[%s1434_s26 + $0xb8] sm:$0xff] }
  0x1a   : > { %v1318_v30 = vld [vmem:[%s1434_s26 + $0xf0] sm:$0xff]  ;;  %v1319_v34 = vld [vmem:[%s1434_s26 + $0xf8] sm:$0xff] }
  0x28   : > { %1255 = vmatmul.msk.bf16.gmra.mxu0 %vm478_vm0, %v1289_v7  ;;  %1263 = vmatmul.msk.bf16.gmra.mxu1 %vm478_vm0, %v1297_v8 }
  0x29   : > { %1271 = vmatmul.msk.bf16.gmra.mxu2 %vm478_vm0, %v1305_v9  ;;  %1279 = vmatmul.msk.bf16.gmra.mxu3 %vm478_vm0, %v1313_v10 }
  0x38   : > { %1256 = vmatmul.msk.bf16.gmra.mxu0 %vm478_vm0, %v1290_v11  ;;  %1264 = vmatmul.msk.bf16.gmra.mxu1 %vm478_vm0, %v1298_v12 }
  0x39   : > { %1272 = vmatmul.msk.bf16.gmra.mxu2 %vm478_vm0, %v1306_v13  ;;  %1280 = vmatmul.msk.bf16.gmra.mxu3 %vm478_vm0, %v1314_v14 }
  0x48   : > { %1257 = vmatmul.msk.bf16.gmra.mxu0 %vm478_vm0, %v1291_v15  ;;  %1265 = vmatmul.msk.bf16.gmra.mxu1 %vm478_vm0, %v1299_v16 }
  0x49   : > { %1273 = vmatmul.msk.bf16.gmra.mxu2 %vm478_vm0, %v1307_v17  ;;  %1281 = vmatmul.msk.bf16.gmra.mxu3 %vm478_vm0, %v1315_v18 }
  0x58   : > { %1258 = vmatmul.msk.bf16.gmra.mxu0 %vm478_vm0, %v1292_v19  ;;  %1266 = vmatmul.msk.bf16.gmra.mxu1 %vm478_vm0, %v1300_v20 }
  0x59   : > { %1274 = vmatmul.msk.bf16.gmra.mxu2 %vm478_vm0, %v1308_v21  ;;  %1282 = vmatmul.msk.bf16.gmra.mxu3 %vm478_vm0, %v1316_v22 }
  0x68   : > { %1259 = vmatmul.msk.bf16.gmra.mxu0 %vm478_vm0, %v1293_v23  ;;  %1267 = vmatmul.msk.bf16.gmra.mxu1 %vm478_vm0, %v1301_v24 }
  0x69   : > { %1275 = vmatmul.msk.bf16.gmra.mxu2 %vm478_vm0, %v1309_v25  ;;  %1283 = vmatmul.msk.bf16.gmra.mxu3 %vm478_vm0, %v1317_v26 }
  0x78   : > { %1260 = vmatmul.msk.bf16.gmra.mxu0 %vm478_vm0, %v1294_v27  ;;  %1268 = vmatmul.msk.bf16.gmra.mxu1 %vm478_vm0, %v1302_v28 }
  0x79   : > { %1276 = vmatmul.msk.bf16.gmra.mxu2 %vm478_vm0, %v1310_v29  ;;  %1284 = vmatmul.msk.bf16.gmra.mxu3 %vm478_vm0, %v1318_v30 }
  0x88   : > { %1261 = vmatmul.msk.bf16.gmra.mxu0 %vm478_vm0, %v1295_v31  ;;  %1269 = vmatmul.msk.bf16.gmra.mxu1 %vm478_vm0, %v1303_v32 }
  0x89   : > { %1277 = vmatmul.msk.bf16.gmra.mxu2 %vm478_vm0, %v1311_v33  ;;  %1285 = vmatmul.msk.bf16.gmra.mxu3 %vm478_vm0, %v1319_v34 }
  0x95   : > { %v584_v36 = vpop.f32.mrf.mxu0  ;;  %v624_v37 = vpop.f32.mrf.mxu1 }
  0x96   : > { %v585_v38 = vadd.f32 %v1503_v35, %v584_v36  ;;  %v625_v39 = vadd.f32 %v1503_v35, %v624_v37 }
  0x98   : > { %vm744_vm2 = vcmp.gt.f32.partialorder %v585_v38, 0.0  ;;  %v808_v40 = vmul.f32 0.2, %v585_v38  ;;  %vm760_vm3 = vcmp.gt.f32.partialorder %v625_v39, 0.0  ;;  %v824_v41 = vmul.f32 0.2, %v625_v39 }
  0x9a   : > { %v872_v42 = vsel %vm744_vm2, %v585_v38, %v808_v40  ;;  %v888_v43 = vsel %vm760_vm3, %v625_v39, %v824_v41 }
  0x9b   : > { %937 = vst.msk [vmem:[%s1511_s5] sm:$0xff] %vm936_vm1, %v872_v42 }
  0x9c   : > { %953 = vst.msk [vmem:[%s1511_s5 + $0x80] sm:$0xff] %vm936_vm1, %v888_v43  ;;  %v664_v44 = vpop.f32.mrf.mxu2  ;;  %v704_v45 = vpop.f32.mrf.mxu3 }
  0x9d   : > { %v665_v46 = vadd.f32 %v1503_v35, %v664_v44  ;;  %v705_v47 = vadd.f32 %v1503_v35, %v704_v45  ;;  %v586_v48 = vpop.f32.mrf.mxu0  ;;  %v626_v49 = vpop.f32.mrf.mxu1 }
  0x9e   : > { %v587_v50 = vadd.f32 %v1503_v35, %v586_v48  ;;  %v627_v51 = vadd.f32 %v1503_v35, %v626_v49 }
  0x9f   : > { %vm776_vm4 = vcmp.gt.f32.partialorder %v665_v46, 0.0  ;;  %v840_v52 = vmul.f32 0.2, %v665_v46  ;;  %vm792_vm5 = vcmp.gt.f32.partialorder %v705_v47, 0.0  ;;  %v856_v53 = vmul.f32 0.2, %v705_v47 }
  0xa0   : > { %vm745_vm6 = vcmp.gt.f32.partialorder %v587_v50, 0.0  ;;  %v809_v54 = vmul.f32 0.2, %v587_v50  ;;  %vm761_vm7 = vcmp.gt.f32.partialorder %v627_v51, 0.0  ;;  %v825_v55 = vmul.f32 0.2, %v627_v51 }
  0xa1   : > { %v904_v56 = vsel %vm776_vm4, %v665_v46, %v840_v52  ;;  %v920_v57 = vsel %vm792_vm5, %v705_v47, %v856_v53 }
  0xa2   : > { %969 = vst.msk [vmem:[%s1511_s5 + $0x100] sm:$0xff] %vm936_vm1, %v904_v56  ;;  %v873_v58 = vsel %vm745_vm6, %v587_v50, %v809_v54  ;;  %v889_v59 = vsel %vm761_vm7, %v627_v51, %v825_v55 }
  0xa3   : > { %985 = vst.msk [vmem:[%s1511_s5 + $0x180] sm:$0xff] %vm936_vm1, %v920_v57 }
  0xa4   : > { %938 = vst.msk [vmem:[%s1511_s5 + $0x8] sm:$0xff] %vm936_vm1, %v873_v58  ;;  %v666_v60 = vpop.f32.mrf.mxu2  ;;  %v706_v61 = vpop.f32.mrf.mxu3 }
  0xa5   : > { %954 = vst.msk [vmem:[%s1511_s5 + $0x88] sm:$0xff] %vm936_vm1, %v889_v59  ;;  %v667_v62 = vadd.f32 %v1503_v35, %v666_v60  ;;  %v707_v63 = vadd.f32 %v1503_v35, %v706_v61  ;;  %v589_v0 = vpop.f32.mrf.mxu0  ;;  %v629_v1 = vpop.f32.mrf.mxu1 }
  0xa6   : > { %v590_v2 = vadd.f32 %v1503_v35, %v589_v0  ;;  %v630_v3 = vadd.f32 %v1503_v35, %v629_v1 }
  0xa7   : > { %vm777_vm8 = vcmp.gt.f32.partialorder %v667_v62, 0.0  ;;  %v841_v4 = vmul.f32 0.2, %v667_v62  ;;  %vm793_vm9 = vcmp.gt.f32.partialorder %v707_v63, 0.0  ;;  %v857_v5 = vmul.f32 0.2, %v707_v63 }
  0xa8   : > { %vm746_vm10 = vcmp.gt.f32.partialorder %v590_v2, 0.0  ;;  %v810_v6 = vmul.f32 0.2, %v590_v2  ;;  %vm762_vm11 = vcmp.gt.f32.partialorder %v630_v3, 0.0  ;;  %v826_v7 = vmul.f32 0.2, %v630_v3 }
  0xa9   : > { %v905_v8 = vsel %vm777_vm8, %v667_v62, %v841_v4  ;;  %v921_v9 = vsel %vm793_vm9, %v707_v63, %v857_v5 }
  0xaa   : > { %970 = vst.msk [vmem:[%s1511_s5 + $0x108] sm:$0xff] %vm936_vm1, %v905_v8  ;;  %v874_v10 = vsel %vm746_vm10, %v590_v2, %v810_v6  ;;  %v890_v11 = vsel %vm762_vm11, %v630_v3, %v826_v7 }
  0xab   : > { %986 = vst.msk [vmem:[%s1511_s5 + $0x188] sm:$0xff] %vm936_vm1, %v921_v9 }
  0xac   : > { %939 = vst.msk [vmem:[%s1511_s5 + $0x10] sm:$0xff] %vm936_vm1, %v874_v10  ;;  %v669_v12 = vpop.f32.mrf.mxu2  ;;  %v709_v13 = vpop.f32.mrf.mxu3 }
  0xad   : > { %955 = vst.msk [vmem:[%s1511_s5 + $0x90] sm:$0xff] %vm936_vm1, %v890_v11  ;;  %v670_v14 = vadd.f32 %v1503_v35, %v669_v12  ;;  %v710_v15 = vadd.f32 %v1503_v35, %v709_v13  ;;  %v591_v16 = vpop.f32.mrf.mxu0  ;;  %v631_v17 = vpop.f32.mrf.mxu1 }
  0xae   : > { %v592_v18 = vadd.f32 %v1503_v35, %v591_v16  ;;  %v632_v19 = vadd.f32 %v1503_v35, %v631_v17 }
  0xaf   : > { %vm778_vm12 = vcmp.gt.f32.partialorder %v670_v14, 0.0  ;;  %v842_v20 = vmul.f32 0.2, %v670_v14  ;;  %vm794_vm13 = vcmp.gt.f32.partialorder %v710_v15, 0.0  ;;  %v858_v21 = vmul.f32 0.2, %v710_v15 }
  0xb0   : > { %vm747_vm14 = vcmp.gt.f32.partialorder %v592_v18, 0.0  ;;  %v811_v22 = vmul.f32 0.2, %v592_v18  ;;  %vm763_vm15 = vcmp.gt.f32.partialorder %v632_v19, 0.0  ;;  %v827_v23 = vmul.f32 0.2, %v632_v19 }
  0xb1   : > { %v906_v24 = vsel %vm778_vm12, %v670_v14, %v842_v20  ;;  %v922_v25 = vsel %vm794_vm13, %v710_v15, %v858_v21 }
  0xb2   : > { %971 = vst.msk [vmem:[%s1511_s5 + $0x110] sm:$0xff] %vm936_vm1, %v906_v24  ;;  %v875_v26 = vsel %vm747_vm14, %v592_v18, %v811_v22  ;;  %v891_v27 = vsel %vm763_vm15, %v632_v19, %v827_v23 }
  0xb3   : > { %987 = vst.msk [vmem:[%s1511_s5 + $0x190] sm:$0xff] %vm936_vm1, %v922_v25 }
  0xb4   : > { %940 = vst.msk [vmem:[%s1511_s5 + $0x18] sm:$0xff] %vm936_vm1, %v875_v26  ;;  %v671_v28 = vpop.f32.mrf.mxu2  ;;  %v711_v29 = vpop.f32.mrf.mxu3 }
  0xb5   : > { %956 = vst.msk [vmem:[%s1511_s5 + $0x98] sm:$0xff] %vm936_vm1, %v891_v27  ;;  %v672_v30 = vadd.f32 %v1503_v35, %v671_v28  ;;  %v712_v31 = vadd.f32 %v1503_v35, %v711_v29  ;;  %v594_v32 = vpop.f32.mrf.mxu0  ;;  %v634_v33 = vpop.f32.mrf.mxu1 }
  0xb6   : > { %v595_v34 = vadd.f32 %v1503_v35, %v594_v32  ;;  %v635_v36 = vadd.f32 %v1503_v35, %v634_v33 }
  0xb7   : > { %vm779_vm0 = vcmp.gt.f32.partialorder %v672_v30, 0.0  ;;  %v843_v37 = vmul.f32 0.2, %v672_v30  ;;  %vm795_vm2 = vcmp.gt.f32.partialorder %v712_v31, 0.0  ;;  %v859_v38 = vmul.f32 0.2, %v712_v31 }
  0xb8   : > { %vm748_vm3 = vcmp.gt.f32.partialorder %v595_v34, 0.0  ;;  %v812_v39 = vmul.f32 0.2, %v595_v34  ;;  %vm764_vm4 = vcmp.gt.f32.partialorder %v635_v36, 0.0  ;;  %v828_v40 = vmul.f32 0.2, %v635_v36 }
  0xb9   : > { %v907_v41 = vsel %vm779_vm0, %v672_v30, %v843_v37  ;;  %v923_v42 = vsel %vm795_vm2, %v712_v31, %v859_v38 }
  0xba   : > { %972 = vst.msk [vmem:[%s1511_s5 + $0x118] sm:$0xff] %vm936_vm1, %v907_v41  ;;  %v876_v43 = vsel %vm748_vm3, %v595_v34, %v812_v39  ;;  %v892_v44 = vsel %vm764_vm4, %v635_v36, %v828_v40 }
  0xbb   : > { %988 = vst.msk [vmem:[%s1511_s5 + $0x198] sm:$0xff] %vm936_vm1, %v923_v42 }
  0xbc   : > { %941 = vst.msk [vmem:[%s1511_s5 + $0x20] sm:$0xff] %vm936_vm1, %v876_v43  ;;  %v674_v45 = vpop.f32.mrf.mxu2  ;;  %v714_v46 = vpop.f32.mrf.mxu3 }
  0xbd   : > { %957 = vst.msk [vmem:[%s1511_s5 + $0xa0] sm:$0xff] %vm936_vm1, %v892_v44  ;;  %v675_v47 = vadd.f32 %v1503_v35, %v674_v45  ;;  %v715_v48 = vadd.f32 %v1503_v35, %v714_v46  ;;  %v596_v49 = vpop.f32.mrf.mxu0  ;;  %v636_v50 = vpop.f32.mrf.mxu1 }
  0xbe   : > { %v597_v51 = vadd.f32 %v1503_v35, %v596_v49  ;;  %v637_v52 = vadd.f32 %v1503_v35, %v636_v50 }
  0xbf   : > { %vm780_vm5 = vcmp.gt.f32.partialorder %v675_v47, 0.0  ;;  %v844_v53 = vmul.f32 0.2, %v675_v47  ;;  %vm796_vm6 = vcmp.gt.f32.partialorder %v715_v48, 0.0  ;;  %v860_v54 = vmul.f32 0.2, %v715_v48 }
  0xc0   : > { %vm749_vm7 = vcmp.gt.f32.partialorder %v597_v51, 0.0  ;;  %v813_v55 = vmul.f32 0.2, %v597_v51  ;;  %vm765_vm8 = vcmp.gt.f32.partialorder %v637_v52, 0.0  ;;  %v829_v56 = vmul.f32 0.2, %v637_v52 }
  0xc1   : > { %v908_v57 = vsel %vm780_vm5, %v675_v47, %v844_v53  ;;  %v924_v58 = vsel %vm796_vm6, %v715_v48, %v860_v54 }
  0xc2   : > { %973 = vst.msk [vmem:[%s1511_s5 + $0x120] sm:$0xff] %vm936_vm1, %v908_v57  ;;  %v877_v59 = vsel %vm749_vm7, %v597_v51, %v813_v55  ;;  %v893_v60 = vsel %vm765_vm8, %v637_v52, %v829_v56 }
  0xc3   : > { %989 = vst.msk [vmem:[%s1511_s5 + $0x1a0] sm:$0xff] %vm936_vm1, %v924_v58 }
  0xc4   : > { %942 = vst.msk [vmem:[%s1511_s5 + $0x28] sm:$0xff] %vm936_vm1, %v877_v59  ;;  %v676_v61 = vpop.f32.mrf.mxu2  ;;  %v716_v62 = vpop.f32.mrf.mxu3 }
  0xc5   : > { %958 = vst.msk [vmem:[%s1511_s5 + $0xa8] sm:$0xff] %vm936_vm1, %v893_v60  ;;  %v677_v63 = vadd.f32 %v1503_v35, %v676_v61  ;;  %v717_v0 = vadd.f32 %v1503_v35, %v716_v62  ;;  %v599_v1 = vpop.f32.mrf.mxu0  ;;  %v639_v2 = vpop.f32.mrf.mxu1 }
  0xc6   : > { %v600_v3 = vadd.f32 %v1503_v35, %v599_v1  ;;  %v640_v4 = vadd.f32 %v1503_v35, %v639_v2 }
  0xc7   : > { %vm781_vm9 = vcmp.gt.f32.partialorder %v677_v63, 0.0  ;;  %v845_v5 = vmul.f32 0.2, %v677_v63  ;;  %vm797_vm10 = vcmp.gt.f32.partialorder %v717_v0, 0.0  ;;  %v861_v6 = vmul.f32 0.2, %v717_v0 }
  0xc8   : > { %vm750_vm11 = vcmp.gt.f32.partialorder %v600_v3, 0.0  ;;  %v814_v7 = vmul.f32 0.2, %v600_v3  ;;  %vm766_vm12 = vcmp.gt.f32.partialorder %v640_v4, 0.0  ;;  %v830_v8 = vmul.f32 0.2, %v640_v4 }
  0xc9   : > { %v909_v9 = vsel %vm781_vm9, %v677_v63, %v845_v5  ;;  %v925_v10 = vsel %vm797_vm10, %v717_v0, %v861_v6 }
  0xca   : > { %974 = vst.msk [vmem:[%s1511_s5 + $0x128] sm:$0xff] %vm936_vm1, %v909_v9  ;;  %v878_v11 = vsel %vm750_vm11, %v600_v3, %v814_v7  ;;  %v894_v12 = vsel %vm766_vm12, %v640_v4, %v830_v8 }
  0xcb   : > { %990 = vst.msk [vmem:[%s1511_s5 + $0x1a8] sm:$0xff] %vm936_vm1, %v925_v10 }
  0xcc   : > { %943 = vst.msk [vmem:[%s1511_s5 + $0x30] sm:$0xff] %vm936_vm1, %v878_v11  ;;  %v679_v13 = vpop.f32.mrf.mxu2  ;;  %v719_v14 = vpop.f32.mrf.mxu3 }
  0xcd   : > { %959 = vst.msk [vmem:[%s1511_s5 + $0xb0] sm:$0xff] %vm936_vm1, %v894_v12  ;;  %v680_v15 = vadd.f32 %v1503_v35, %v679_v13  ;;  %v720_v16 = vadd.f32 %v1503_v35, %v719_v14  ;;  %v601_v17 = vpop.f32.mrf.mxu0  ;;  %v641_v18 = vpop.f32.mrf.mxu1 }
  0xce   : > { %v602_v19 = vadd.f32 %v1503_v35, %v601_v17  ;;  %v642_v20 = vadd.f32 %v1503_v35, %v641_v18 }
  0xcf   : > { %vm782_vm13 = vcmp.gt.f32.partialorder %v680_v15, 0.0  ;;  %v846_v21 = vmul.f32 0.2, %v680_v15  ;;  %vm798_vm14 = vcmp.gt.f32.partialorder %v720_v16, 0.0  ;;  %v862_v22 = vmul.f32 0.2, %v720_v16 }
  0xd0   : > { %vm751_vm15 = vcmp.gt.f32.partialorder %v602_v19, 0.0  ;;  %v815_v23 = vmul.f32 0.2, %v602_v19  ;;  %vm767_vm0 = vcmp.gt.f32.partialorder %v642_v20, 0.0  ;;  %v831_v24 = vmul.f32 0.2, %v642_v20 }
  0xd1   : > { %v910_v25 = vsel %vm782_vm13, %v680_v15, %v846_v21  ;;  %v926_v26 = vsel %vm798_vm14, %v720_v16, %v862_v22 }
  0xd2   : > { %975 = vst.msk [vmem:[%s1511_s5 + $0x130] sm:$0xff] %vm936_vm1, %v910_v25  ;;  %v879_v27 = vsel %vm751_vm15, %v602_v19, %v815_v23  ;;  %v895_v28 = vsel %vm767_vm0, %v642_v20, %v831_v24 }
  0xd3   : > { %991 = vst.msk [vmem:[%s1511_s5 + $0x1b0] sm:$0xff] %vm936_vm1, %v926_v26 }
  0xd4   : > { %944 = vst.msk [vmem:[%s1511_s5 + $0x38] sm:$0xff] %vm936_vm1, %v879_v27  ;;  %v681_v29 = vpop.f32.mrf.mxu2  ;;  %v721_v30 = vpop.f32.mrf.mxu3 }
  0xd5   : > { %960 = vst.msk [vmem:[%s1511_s5 + $0xb8] sm:$0xff] %vm936_vm1, %v895_v28  ;;  %v682_v31 = vadd.f32 %v1503_v35, %v681_v29  ;;  %v722_v32 = vadd.f32 %v1503_v35, %v721_v30  ;;  %v604_v33 = vpop.f32.mrf.mxu0  ;;  %v644_v34 = vpop.f32.mrf.mxu1 }
  0xd6   : > { %v605_v36 = vadd.f32 %v1503_v35, %v604_v33  ;;  %v645_v37 = vadd.f32 %v1503_v35, %v644_v34 }
  0xd7   : > { %vm783_vm2 = vcmp.gt.f32.partialorder %v682_v31, 0.0  ;;  %v847_v38 = vmul.f32 0.2, %v682_v31  ;;  %vm799_vm3 = vcmp.gt.f32.partialorder %v722_v32, 0.0  ;;  %v863_v39 = vmul.f32 0.2, %v722_v32 }
  0xd8   : > { %vm752_vm4 = vcmp.gt.f32.partialorder %v605_v36, 0.0  ;;  %v816_v40 = vmul.f32 0.2, %v605_v36  ;;  %vm768_vm5 = vcmp.gt.f32.partialorder %v645_v37, 0.0  ;;  %v832_v41 = vmul.f32 0.2, %v645_v37 }
  0xd9   : > { %v911_v42 = vsel %vm783_vm2, %v682_v31, %v847_v38  ;;  %v927_v43 = vsel %vm799_vm3, %v722_v32, %v863_v39 }
  0xda   : > { %976 = vst.msk [vmem:[%s1511_s5 + $0x138] sm:$0xff] %vm936_vm1, %v911_v42  ;;  %v880_v44 = vsel %vm752_vm4, %v605_v36, %v816_v40  ;;  %v896_v45 = vsel %vm768_vm5, %v645_v37, %v832_v41 }
  0xdb   : > { %992 = vst.msk [vmem:[%s1511_s5 + $0x1b8] sm:$0xff] %vm936_vm1, %v927_v43 }
  0xdc   : > { %945 = vst.msk [vmem:[%s1511_s5 + $0x40] sm:$0xff] %vm936_vm1, %v880_v44  ;;  %v684_v46 = vpop.f32.mrf.mxu2  ;;  %v724_v47 = vpop.f32.mrf.mxu3 }
  0xdd   : > { %961 = vst.msk [vmem:[%s1511_s5 + $0xc0] sm:$0xff] %vm936_vm1, %v896_v45  ;;  %v685_v48 = vadd.f32 %v1503_v35, %v684_v46  ;;  %v725_v49 = vadd.f32 %v1503_v35, %v724_v47  ;;  %v606_v50 = vpop.f32.mrf.mxu0  ;;  %v646_v51 = vpop.f32.mrf.mxu1 }
  0xde   : > { %v607_v52 = vadd.f32 %v1503_v35, %v606_v50  ;;  %v647_v53 = vadd.f32 %v1503_v35, %v646_v51 }
  0xdf   : > { %vm784_vm6 = vcmp.gt.f32.partialorder %v685_v48, 0.0  ;;  %v848_v54 = vmul.f32 0.2, %v685_v48  ;;  %vm800_vm7 = vcmp.gt.f32.partialorder %v725_v49, 0.0  ;;  %v864_v55 = vmul.f32 0.2, %v725_v49 }
  0xe0   : > { %vm753_vm8 = vcmp.gt.f32.partialorder %v607_v52, 0.0  ;;  %v817_v56 = vmul.f32 0.2, %v607_v52  ;;  %vm769_vm9 = vcmp.gt.f32.partialorder %v647_v53, 0.0  ;;  %v833_v57 = vmul.f32 0.2, %v647_v53 }
  0xe1   : > { %v912_v58 = vsel %vm784_vm6, %v685_v48, %v848_v54  ;;  %v928_v59 = vsel %vm800_vm7, %v725_v49, %v864_v55 }
  0xe2   : > { %977 = vst.msk [vmem:[%s1511_s5 + $0x140] sm:$0xff] %vm936_vm1, %v912_v58  ;;  %v881_v60 = vsel %vm753_vm8, %v607_v52, %v817_v56  ;;  %v897_v61 = vsel %vm769_vm9, %v647_v53, %v833_v57 }
  0xe3   : > { %993 = vst.msk [vmem:[%s1511_s5 + $0x1c0] sm:$0xff] %vm936_vm1, %v928_v59 }
  0xe4   : > { %946 = vst.msk [vmem:[%s1511_s5 + $0x48] sm:$0xff] %vm936_vm1, %v881_v60  ;;  %v686_v62 = vpop.f32.mrf.mxu2  ;;  %v726_v63 = vpop.f32.mrf.mxu3 }
  0xe5   : > { %962 = vst.msk [vmem:[%s1511_s5 + $0xc8] sm:$0xff] %vm936_vm1, %v897_v61  ;;  %v687_v0 = vadd.f32 %v1503_v35, %v686_v62  ;;  %v727_v1 = vadd.f32 %v1503_v35, %v726_v63  ;;  %v609_v2 = vpop.f32.mrf.mxu0  ;;  %v649_v3 = vpop.f32.mrf.mxu1 }
  0xe6   : > { %v610_v4 = vadd.f32 %v1503_v35, %v609_v2  ;;  %v650_v5 = vadd.f32 %v1503_v35, %v649_v3 }
  0xe7   : > { %vm785_vm10 = vcmp.gt.f32.partialorder %v687_v0, 0.0  ;;  %v849_v6 = vmul.f32 0.2, %v687_v0  ;;  %vm801_vm11 = vcmp.gt.f32.partialorder %v727_v1, 0.0  ;;  %v865_v7 = vmul.f32 0.2, %v727_v1 }
  0xe8   : > { %vm754_vm12 = vcmp.gt.f32.partialorder %v610_v4, 0.0  ;;  %v818_v8 = vmul.f32 0.2, %v610_v4  ;;  %vm770_vm13 = vcmp.gt.f32.partialorder %v650_v5, 0.0  ;;  %v834_v9 = vmul.f32 0.2, %v650_v5 }
  0xe9   : > { %v913_v10 = vsel %vm785_vm10, %v687_v0, %v849_v6  ;;  %v929_v11 = vsel %vm801_vm11, %v727_v1, %v865_v7 }
  0xea   : > { %978 = vst.msk [vmem:[%s1511_s5 + $0x148] sm:$0xff] %vm936_vm1, %v913_v10  ;;  %v882_v12 = vsel %vm754_vm12, %v610_v4, %v818_v8  ;;  %v898_v13 = vsel %vm770_vm13, %v650_v5, %v834_v9 }
  0xeb   : > { %994 = vst.msk [vmem:[%s1511_s5 + $0x1c8] sm:$0xff] %vm936_vm1, %v929_v11 }
  0xec   : > { %947 = vst.msk [vmem:[%s1511_s5 + $0x50] sm:$0xff] %vm936_vm1, %v882_v12  ;;  %v689_v14 = vpop.f32.mrf.mxu2  ;;  %v729_v15 = vpop.f32.mrf.mxu3 }
  0xed   : > { %963 = vst.msk [vmem:[%s1511_s5 + $0xd0] sm:$0xff] %vm936_vm1, %v898_v13  ;;  %v690_v16 = vadd.f32 %v1503_v35, %v689_v14  ;;  %v730_v17 = vadd.f32 %v1503_v35, %v729_v15  ;;  %v611_v18 = vpop.f32.mrf.mxu0  ;;  %v651_v19 = vpop.f32.mrf.mxu1 }
  0xee   : > { %v612_v20 = vadd.f32 %v1503_v35, %v611_v18  ;;  %v652_v21 = vadd.f32 %v1503_v35, %v651_v19 }
  0xef   : > { %vm786_vm14 = vcmp.gt.f32.partialorder %v690_v16, 0.0  ;;  %v850_v22 = vmul.f32 0.2, %v690_v16  ;;  %vm802_vm15 = vcmp.gt.f32.partialorder %v730_v17, 0.0  ;;  %v866_v23 = vmul.f32 0.2, %v730_v17 }
  0xf0   : > { %vm755_vm0 = vcmp.gt.f32.partialorder %v612_v20, 0.0  ;;  %v819_v24 = vmul.f32 0.2, %v612_v20  ;;  %vm771_vm2 = vcmp.gt.f32.partialorder %v652_v21, 0.0  ;;  %v835_v25 = vmul.f32 0.2, %v652_v21 }
  0xf1   : > { %v914_v26 = vsel %vm786_vm14, %v690_v16, %v850_v22  ;;  %v930_v27 = vsel %vm802_vm15, %v730_v17, %v866_v23 }
  0xf2   : > { %979 = vst.msk [vmem:[%s1511_s5 + $0x150] sm:$0xff] %vm936_vm1, %v914_v26  ;;  %v883_v28 = vsel %vm755_vm0, %v612_v20, %v819_v24  ;;  %v899_v29 = vsel %vm771_vm2, %v652_v21, %v835_v25 }
  0xf3   : > { %995 = vst.msk [vmem:[%s1511_s5 + $0x1d0] sm:$0xff] %vm936_vm1, %v930_v27 }
  0xf4   : > { %948 = vst.msk [vmem:[%s1511_s5 + $0x58] sm:$0xff] %vm936_vm1, %v883_v28  ;;  %v691_v30 = vpop.f32.mrf.mxu2  ;;  %v731_v31 = vpop.f32.mrf.mxu3 }
  0xf5   : > { %964 = vst.msk [vmem:[%s1511_s5 + $0xd8] sm:$0xff] %vm936_vm1, %v899_v29  ;;  %v692_v32 = vadd.f32 %v1503_v35, %v691_v30  ;;  %v732_v33 = vadd.f32 %v1503_v35, %v731_v31  ;;  %v614_v34 = vpop.f32.mrf.mxu0  ;;  %v654_v36 = vpop.f32.mrf.mxu1 }
  0xf6   : > { %v615_v37 = vadd.f32 %v1503_v35, %v614_v34  ;;  %v655_v38 = vadd.f32 %v1503_v35, %v654_v36 }
  0xf7   : > { %vm787_vm3 = vcmp.gt.f32.partialorder %v692_v32, 0.0  ;;  %v851_v39 = vmul.f32 0.2, %v692_v32  ;;  %vm803_vm4 = vcmp.gt.f32.partialorder %v732_v33, 0.0  ;;  %v867_v40 = vmul.f32 0.2, %v732_v33 }
  0xf8   : > { %vm756_vm5 = vcmp.gt.f32.partialorder %v615_v37, 0.0  ;;  %v820_v41 = vmul.f32 0.2, %v615_v37  ;;  %vm772_vm6 = vcmp.gt.f32.partialorder %v655_v38, 0.0  ;;  %v836_v42 = vmul.f32 0.2, %v655_v38 }
  0xf9   : > { %v915_v43 = vsel %vm787_vm3, %v692_v32, %v851_v39  ;;  %v931_v44 = vsel %vm803_vm4, %v732_v33, %v867_v40 }
  0xfa   : > { %980 = vst.msk [vmem:[%s1511_s5 + $0x158] sm:$0xff] %vm936_vm1, %v915_v43  ;;  %v884_v45 = vsel %vm756_vm5, %v615_v37, %v820_v41  ;;  %v900_v46 = vsel %vm772_vm6, %v655_v38, %v836_v42 }
  0xfb   : > { %996 = vst.msk [vmem:[%s1511_s5 + $0x1d8] sm:$0xff] %vm936_vm1, %v931_v44 }
  0xfc   : > { %949 = vst.msk [vmem:[%s1511_s5 + $0x60] sm:$0xff] %vm936_vm1, %v884_v45  ;;  %v694_v47 = vpop.f32.mrf.mxu2  ;;  %v734_v48 = vpop.f32.mrf.mxu3 }
  0xfd   : > { %965 = vst.msk [vmem:[%s1511_s5 + $0xe0] sm:$0xff] %vm936_vm1, %v900_v46  ;;  %v695_v49 = vadd.f32 %v1503_v35, %v694_v47  ;;  %v735_v50 = vadd.f32 %v1503_v35, %v734_v48  ;;  %v616_v51 = vpop.f32.mrf.mxu0  ;;  %v656_v52 = vpop.f32.mrf.mxu1 }
  0xfe   : > { %v617_v53 = vadd.f32 %v1503_v35, %v616_v51  ;;  %v657_v54 = vadd.f32 %v1503_v35, %v656_v52 }
  0xff   : > { %vm788_vm7 = vcmp.gt.f32.partialorder %v695_v49, 0.0  ;;  %v852_v55 = vmul.f32 0.2, %v695_v49  ;;  %vm804_vm8 = vcmp.gt.f32.partialorder %v735_v50, 0.0  ;;  %v868_v56 = vmul.f32 0.2, %v735_v50 }
 0x100   : > { %vm757_vm9 = vcmp.gt.f32.partialorder %v617_v53, 0.0  ;;  %v821_v57 = vmul.f32 0.2, %v617_v53  ;;  %vm773_vm10 = vcmp.gt.f32.partialorder %v657_v54, 0.0  ;;  %v837_v58 = vmul.f32 0.2, %v657_v54 }
 0x101   : > { %v916_v59 = vsel %vm788_vm7, %v695_v49, %v852_v55  ;;  %v932_v60 = vsel %vm804_vm8, %v735_v50, %v868_v56 }
 0x102   : > { %981 = vst.msk [vmem:[%s1511_s5 + $0x160] sm:$0xff] %vm936_vm1, %v916_v59  ;;  %v885_v61 = vsel %vm757_vm9, %v617_v53, %v821_v57  ;;  %v901_v62 = vsel %vm773_vm10, %v657_v54, %v837_v58 }
 0x103   : > { %997 = vst.msk [vmem:[%s1511_s5 + $0x1e0] sm:$0xff] %vm936_vm1, %v932_v60 }
 0x104   : > { %950 = vst.msk [vmem:[%s1511_s5 + $0x68] sm:$0xff] %vm936_vm1, %v885_v61  ;;  %v696_v63 = vpop.f32.mrf.mxu2  ;;  %v736_v0 = vpop.f32.mrf.mxu3 }
 0x105   : > { %966 = vst.msk [vmem:[%s1511_s5 + $0xe8] sm:$0xff] %vm936_vm1, %v901_v62  ;;  %v697_v1 = vadd.f32 %v1503_v35, %v696_v63  ;;  %v737_v2 = vadd.f32 %v1503_v35, %v736_v0  ;;  %v619_v3 = vpop.f32.mrf.mxu0  ;;  %v659_v4 = vpop.f32.mrf.mxu1 }
 0x106   : > { %v620_v5 = vadd.f32 %v1503_v35, %v619_v3  ;;  %v660_v6 = vadd.f32 %v1503_v35, %v659_v4 }
 0x107   : > { %vm789_vm11 = vcmp.gt.f32.partialorder %v697_v1, 0.0  ;;  %v853_v7 = vmul.f32 0.2, %v697_v1  ;;  %vm805_vm12 = vcmp.gt.f32.partialorder %v737_v2, 0.0  ;;  %v869_v8 = vmul.f32 0.2, %v737_v2 }
 0x108   : > { %vm758_vm13 = vcmp.gt.f32.partialorder %v620_v5, 0.0  ;;  %v822_v9 = vmul.f32 0.2, %v620_v5  ;;  %vm774_vm14 = vcmp.gt.f32.partialorder %v660_v6, 0.0  ;;  %v838_v10 = vmul.f32 0.2, %v660_v6 }
 0x109   : > { %v917_v11 = vsel %vm789_vm11, %v697_v1, %v853_v7  ;;  %v933_v12 = vsel %vm805_vm12, %v737_v2, %v869_v8 }
 0x10a   : > { %982 = vst.msk [vmem:[%s1511_s5 + $0x168] sm:$0xff] %vm936_vm1, %v917_v11  ;;  %v886_v13 = vsel %vm758_vm13, %v620_v5, %v822_v9  ;;  %v902_v14 = vsel %vm774_vm14, %v660_v6, %v838_v10 }
 0x10b   : > { %998 = vst.msk [vmem:[%s1511_s5 + $0x1e8] sm:$0xff] %vm936_vm1, %v933_v12 }
 0x10c   : > { %951 = vst.msk [vmem:[%s1511_s5 + $0x70] sm:$0xff] %vm936_vm1, %v886_v13  ;;  %v699_v15 = vpop.f32.mrf.mxu2  ;;  %v739_v16 = vpop.f32.mrf.mxu3 }
 0x10d   : > { %967 = vst.msk [vmem:[%s1511_s5 + $0xf0] sm:$0xff] %vm936_vm1, %v902_v14  ;;  %v700_v17 = vadd.f32 %v1503_v35, %v699_v15  ;;  %v740_v18 = vadd.f32 %v1503_v35, %v739_v16  ;;  %v621_v19 = vpop.f32.mrf.mxu0  ;;  %v661_v20 = vpop.f32.mrf.mxu1 }
 0x10e   : > { %v622_v21 = vadd.f32 %v1503_v35, %v621_v19  ;;  %v662_v22 = vadd.f32 %v1503_v35, %v661_v20 }
 0x10f   : > { %vm790_vm15 = vcmp.gt.f32.partialorder %v700_v17, 0.0  ;;  %v854_v23 = vmul.f32 0.2, %v700_v17  ;;  %vm806_vm0 = vcmp.gt.f32.partialorder %v740_v18, 0.0  ;;  %v870_v24 = vmul.f32 0.2, %v740_v18 }
 0x110   : > { %vm759_vm2 = vcmp.gt.f32.partialorder %v622_v21, 0.0  ;;  %v823_v25 = vmul.f32 0.2, %v622_v21  ;;  %vm775_vm3 = vcmp.gt.f32.partialorder %v662_v22, 0.0  ;;  %v839_v26 = vmul.f32 0.2, %v662_v22 }
 0x111   : > { %v918_v27 = vsel %vm790_vm15, %v700_v17, %v854_v23  ;;  %v934_v28 = vsel %vm806_vm0, %v740_v18, %v870_v24 }
 0x112   : > { %983 = vst.msk [vmem:[%s1511_s5 + $0x170] sm:$0xff] %vm936_vm1, %v918_v27  ;;  %v887_v29 = vsel %vm759_vm2, %v622_v21, %v823_v25  ;;  %v903_v30 = vsel %vm775_vm3, %v662_v22, %v839_v26 }
 0x113   : > { %999 = vst.msk [vmem:[%s1511_s5 + $0x1f0] sm:$0xff] %vm936_vm1, %v934_v28 }
 0x114   : > { %952 = vst.msk [vmem:[%s1511_s5 + $0x78] sm:$0xff] %vm936_vm1, %v887_v29  ;;  %v701_v31 = vpop.f32.mrf.mxu2  ;;  %v741_v32 = vpop.f32.mrf.mxu3 }
 0x115   : > { %968 = vst.msk [vmem:[%s1511_s5 + $0xf8] sm:$0xff] %vm936_vm1, %v903_v30  ;;  %v702_v33 = vadd.f32 %v1503_v35, %v701_v31  ;;  %v742_v34 = vadd.f32 %v1503_v35, %v741_v32 }
 0x117   : > { %vm791_vm4 = vcmp.gt.f32.partialorder %v702_v33, 0.0  ;;  %v855_v36 = vmul.f32 0.2, %v702_v33  ;;  %vm807_vm5 = vcmp.gt.f32.partialorder %v742_v34, 0.0  ;;  %v871_v37 = vmul.f32 0.2, %v742_v34 }
 0x119   : > { %v919_v38 = vsel %vm791_vm4, %v702_v33, %v855_v36  ;;  %v935_v39 = vsel %vm807_vm5, %v742_v34, %v871_v37 }
 0x11a   : > { %984 = vst.msk [vmem:[%s1511_s5 + $0x178] sm:$0xff] %vm936_vm1, %v919_v38 }
 0x11b   : > { %1000 = vst.msk [vmem:[%s1511_s5 + $0x1f8] sm:$0xff] %vm936_vm1, %v935_v39 }
 0x11c PF: > { %s13_s14 = sadd.s32 1, %s1379_s14   ;;  %s1716_s12 = smov %s1375_s13 }
 0x11d   : > { %p10_p5 = scmp.ge.s32.totalorder %s13_s14, 10   ;;  %s1717_s13 = smov %s1719_s15 }
 0x11f   :  { %12 = sbr.rel (!%p10_p5) target bundleno = 2 (0x2), region = 68 }

</bundles_post_ra>
